<compile_context>
chip_gen: v7x
topology: tpu7x:2x2x1
jax: 0.10.0
libtpu: 0.0.40
codegen_flags: <defaults>
</compile_context>

<pallas_src>
import functools
import math

import numpy as np

import jax
import jax.numpy as jnp
from jax.experimental import pallas as pl
from jax.experimental.pallas import tpu as pltpu

CIN, COUT, KH, KW, STRIDE = 8, 8, 3, 3, 2
BN_EPS = 1e-5


def _conv_bn_select_kernel(x_ref, w_ref, p_ref, o_ref, *, n, h2, w2, oh, ow, ncols):
    # x_ref: (4*CIN, ncols)  parity planes stacked on sublanes; plane p = hp*2 + wp
    #                        occupies rows [p*CIN, (p+1)*CIN); column = nn*h2*w2 + r*w2 + c
    # w_ref: (COUT, KH*KW*CIN)  w_ref[co, (i*KW+j)*CIN + ci] = conv_w[co, ci, i, j]
    # p_ref: (ncols + 2*COUT, 1)  rows [0, ncols)        = validity mask (1.0 valid / 0.0 pad)
    #                             rows [ncols, +COUT)     = BatchNorm gamma
    #                             rows [ncols+COUT, +COUT)= BatchNorm beta
    # o_ref: (COUT, ncols)  same column layout; only r < oh, c < ow are valid

    # ---- in-kernel im2col: 5 XLU lane rolls on the inputs, then ONE MXU dot ----------
    x_all = x_ref[...]                                       # (4*CIN, ncols)
    planes = []
    for i in range(KH):
        for j in range(KW):
            p = (i % 2) * 2 + (j % 2)                        # parity plane index
            plane = x_all[p * CIN:(p + 1) * CIN, :]          # (CIN, ncols)
            s = (i // 2) * w2 + (j // 2)                     # source sits s lanes ahead
            if s:
                # rolled[:, col] = plane[:, (col + s) mod ncols]; wrapped lanes only
                # ever land on padding columns (r == h2-1 or c == w2-1), which are
                # masked out of the statistics and sliced off in the wrapper.
                plane = pltpu.roll(plane, ncols - s, axis=1)
            planes.append(plane)
    stacked = jnp.concatenate(planes, axis=0)                # (KH*KW*CIN, ncols) = (72, 128)
    acc = jnp.dot(w_ref[...], stacked,
                  preferred_element_type=jnp.float32)        # (COUT, ncols)

    # ---- train-mode BatchNorm2d statistics on the (idle) MXU -------------------------
    valid = p_ref[0:ncols, :]                                # (ncols, 1)
    gamma = p_ref[ncols:ncols + COUT, :]                     # (COUT, 1)
    beta = p_ref[ncols + COUT:ncols + 2 * COUT, :]           # (COUT, 1)

    stats_in = jnp.concatenate([acc, acc * acc], axis=0)     # (2*COUT, ncols)
    sums = jnp.dot(stats_in, valid,
                   preferred_element_type=jnp.float32)       # (2*COUT, 1): [sum; sumsq]
    inv_count = 1.0 / float(n * oh * ow)
    mean = sums[0:COUT, :] * inv_count                       # (COUT, 1)
    var = sums[COUT:2 * COUT, :] * inv_count - mean * mean   # biased batch variance

    scale = gamma * jax.lax.rsqrt(var + BN_EPS)              # gamma folded into inv_std
    offset = beta - mean * scale
    y = acc * scale + offset
    # torch.where(y > 0, y, y * -0.1)
    o_ref[...] = jnp.where(y > 0.0, y, y * -0.1)


def model_forward(x_nchw, conv_w, conv_b, bn_gamma, bn_beta):
    # conv_b is accepted for interface fidelity but unused: a per-channel constant added
    # before train-mode BatchNorm is exactly cancelled by the batch-mean subtraction.
    del conv_b
    n, c, h, w = x_nchw.shape
    assert c == CIN and h % 2 == 0 and w % 2 == 0
    h2, w2 = h // 2, w // 2
    oh = (h - KH) // STRIDE + 1
    ow = (w - KW) // STRIDE + 1
    ncols = n * h2 * w2
    # Lane-dense, unmasked 128-lane stores (and single-vreg rolls for the test config).
    assert ncols % 128 == 0, ncols

    # activation -> 4 even/odd parity planes stacked on sublanes: (4*CIN, ncols)
    xp = (x_nchw.astype(jnp.float32)
          .reshape(n, CIN, h2, 2, w2, 2)            # (n, c, r, hp, q, wp)
          .transpose(3, 5, 1, 0, 2, 4)              # (hp, wp, c, n, r, q)
          .reshape(4 * CIN, ncols))

    # conv weight (COUT, CIN, KH, KW) -> (COUT, KH*KW*CIN), tap-major columns
    wt = jnp.transpose(conv_w.astype(jnp.float32),
                       (0, 2, 3, 1)).reshape(COUT, KH * KW * CIN)

    # params column = [static validity mask | gamma | beta]
    col = np.arange(ncols)
    valid_np = ((col % w2 < ow) & ((col // w2) % h2 < oh)).astype(np.float32)
    params = jnp.concatenate([
        jnp.asarray(valid_np).reshape(ncols, 1),
        bn_gamma.astype(jnp.float32).reshape(COUT, 1),
        bn_beta.astype(jnp.float32).reshape(COUT, 1),
    ], axis=0)                                       # (ncols + 2*COUT, 1)

    vmem = pl.BlockSpec(memory_space=pltpu.MemorySpace.VMEM)
    out = pl.pallas_call(
        functools.partial(_conv_bn_select_kernel,
                          n=n, h2=h2, w2=w2, oh=oh, ow=ow, ncols=ncols),
        out_shape=jax.ShapeDtypeStruct((COUT, ncols), jnp.float32),
        in_specs=[vmem, vmem, vmem],
        out_specs=vmem,
    )(xp, wt, params)

    # (COUT, ncols) -> NCHW; columns with r == h2-1 or c == w2-1 are padding
    out = out.reshape(COUT, n, h2, w2)[:, :, :oh, :ow]
    return jnp.transpose(out, (1, 0, 2, 3))


def _reference_forward(x, conv_w, conv_b, gamma, beta):
    # Pure-JAX reference (train-mode BN semantics) for a light numerical self-check.
    n, c, h, w = x.shape
    oh = (h - KH) // STRIDE + 1
    ow = (w - KW) // STRIDE + 1
    taps = []
    for i in range(KH):
        for j in range(KW):
            taps.append(x[:, :, i:i + STRIDE * oh:STRIDE, j:j + STRIDE * ow:STRIDE])
    patches = jnp.stack(taps, axis=0)                                    # (9, n, cin, oh, ow)
    wt = conv_w.transpose(2, 3, 0, 1).reshape(KH * KW, COUT, CIN)        # (9, cout, cin)
    conv = jnp.einsum("tnchw,toc->nohw", patches, wt,
                      precision=jax.lax.Precision.HIGHEST)
    conv = conv + conv_b[None, :, None, None]
    mean = conv.mean(axis=(0, 2, 3), keepdims=True)
    var = ((conv - mean) ** 2).mean(axis=(0, 2, 3), keepdims=True)
    y = (conv - mean) * jax.lax.rsqrt(var + BN_EPS)
    y = y * gamma[None, :, None, None] + beta[None, :, None, None]
    return jnp.where(y > 0, y, y * -0.1)


if __name__ == "__main__":
    key = jax.random.PRNGKey(0)
    kx, kw, kb = jax.random.split(key, 3)

    # Small shapes consistent with the module: N=2, C=8, H=W=16 -> conv output 7x7
    x = jax.random.normal(kx, (2, CIN, 16, 16), dtype=jnp.float32)

    fan_in = CIN * KH * KW
    bound = 1.0 / math.sqrt(fan_in)
    conv_w = jax.random.uniform(kw, (COUT, CIN, KH, KW), jnp.float32, -bound, bound)
    conv_b = jax.random.uniform(kb, (COUT,), jnp.float32, -bound, bound)
    bn_gamma = jnp.ones((COUT,), jnp.float32)   # PyTorch BatchNorm2d default weight
    bn_beta = jnp.zeros((COUT,), jnp.float32)   # PyTorch BatchNorm2d default bias

    out = jax.jit(model_forward)(x, conv_w, conv_b, bn_gamma, bn_beta)
    jax.block_until_ready(out)
    assert out.shape == (2, COUT, 7, 7), out.shape

    ref = _reference_forward(x, conv_w, conv_b, bn_gamma, bn_beta)
    err = float(jnp.max(jnp.abs(out - ref)))
    assert err < 2e-2, f"max abs error vs reference: {err}"
    print("KERNEL_OK")
</pallas_src>

<mosaic_0001>
module attributes {stable_mosaic.version = 11 : i64} {
  func.func @_conv_bn_select_kernel(%arg0: memref<32x128xf32, #tpu.memory_space<vmem>>, %arg1: memref<8x72xf32, #tpu.memory_space<vmem>>, %arg2: memref<144x1xf32, #tpu.memory_space<vmem>>, %arg3: memref<8x128xf32, #tpu.memory_space<vmem>>) attributes {dimension_semantics = [], scalar_prefetch = 0 : i64, scratch_operands = 0 : i64, tpu.core_type = #tpu.core_type<tc>} {
    %c0 = arith.constant 0 : index
    %c0_0 = arith.constant 0 : index
    %0 = vector.load %arg0[%c0, %c0_0] : memref<32x128xf32, #tpu.memory_space<vmem>>, vector<32x128xf32>
    %1 = vector.extract_strided_slice %0 {offsets = [0, 0], sizes = [8, 128], strides = [1, 1]} : vector<32x128xf32> to vector<8x128xf32>
    %2 = vector.extract_strided_slice %0 {offsets = [8, 0], sizes = [8, 128], strides = [1, 1]} : vector<32x128xf32> to vector<8x128xf32>
    %3 = vector.extract_strided_slice %0 {offsets = [0, 0], sizes = [8, 128], strides = [1, 1]} : vector<32x128xf32> to vector<8x128xf32>
    %c127_i32 = arith.constant 127 : i32
    %4 = tpu.dynamic_rotate %3 by %c127_i32 dim 1 : vector<8x128xf32>, i32 -> vector<8x128xf32>
    %5 = vector.extract_strided_slice %0 {offsets = [16, 0], sizes = [8, 128], strides = [1, 1]} : vector<32x128xf32> to vector<8x128xf32>
    %6 = vector.extract_strided_slice %0 {offsets = [24, 0], sizes = [8, 128], strides = [1, 1]} : vector<32x128xf32> to vector<8x128xf32>
    %7 = vector.extract_strided_slice %0 {offsets = [16, 0], sizes = [8, 128], strides = [1, 1]} : vector<32x128xf32> to vector<8x128xf32>
    %c127_i32_1 = arith.constant 127 : i32
    %8 = tpu.dynamic_rotate %7 by %c127_i32_1 dim 1 : vector<8x128xf32>, i32 -> vector<8x128xf32>
    %9 = vector.extract_strided_slice %0 {offsets = [0, 0], sizes = [8, 128], strides = [1, 1]} : vector<32x128xf32> to vector<8x128xf32>
    %c120_i32 = arith.constant 120 : i32
    %10 = tpu.dynamic_rotate %9 by %c120_i32 dim 1 : vector<8x128xf32>, i32 -> vector<8x128xf32>
    %11 = vector.extract_strided_slice %0 {offsets = [8, 0], sizes = [8, 128], strides = [1, 1]} : vector<32x128xf32> to vector<8x128xf32>
    %c120_i32_2 = arith.constant 120 : i32
    %12 = tpu.dynamic_rotate %11 by %c120_i32_2 dim 1 : vector<8x128xf32>, i32 -> vector<8x128xf32>
    %13 = vector.extract_strided_slice %0 {offsets = [0, 0], sizes = [8, 128], strides = [1, 1]} : vector<32x128xf32> to vector<8x128xf32>
    %c119_i32 = arith.constant 119 : i32
    %14 = tpu.dynamic_rotate %13 by %c119_i32 dim 1 : vector<8x128xf32>, i32 -> vector<8x128xf32>
    %15 = tpu.concatenate %1, %2, %4, %5, %6, %8, %10, %12, %14 in 0 : vector<8x128xf32>, vector<8x128xf32>, vector<8x128xf32>, vector<8x128xf32>, vector<8x128xf32>, vector<8x128xf32>, vector<8x128xf32>, vector<8x128xf32>, vector<8x128xf32> -> vector<72x128xf32>
    %c0_3 = arith.constant 0 : index
    %c0_4 = arith.constant 0 : index
    %16 = vector.load %arg1[%c0_3, %c0_4] : memref<8x72xf32, #tpu.memory_space<vmem>>, vector<8x72xf32>
    %cst = arith.constant dense<0.000000e+00> : vector<8x128xf32>
    %17 = tpu.matmul %16, %15, %cst {dimension_numbers = #tpu.dot_dimension_numbers<[1], [0], [0], [1], [0, 0, 1, 1], [], []>} : vector<8x72xf32>, vector<72x128xf32>, vector<8x128xf32> -> vector<8x128xf32>
    %c0_5 = arith.constant 0 : index
    %c0_6 = arith.constant 0 : index
    %18 = vector.load %arg2[%c0_5, %c0_6] : memref<144x1xf32, #tpu.memory_space<vmem>>, vector<128x1xf32>
    %c128 = arith.constant 128 : index
    %c0_7 = arith.constant 0 : index
    %19 = vector.load %arg2[%c128, %c0_7] : memref<144x1xf32, #tpu.memory_space<vmem>>, vector<8x1xf32>
    %c136 = arith.constant 136 : index
    %c0_8 = arith.constant 0 : index
    %20 = vector.load %arg2[%c136, %c0_8] : memref<144x1xf32, #tpu.memory_space<vmem>>, vector<8x1xf32>
    %21 = arith.mulf %17, %17 : vector<8x128xf32>
    %22 = tpu.concatenate %17, %21 in 0 : vector<8x128xf32>, vector<8x128xf32> -> vector<16x128xf32>
    %cst_9 = arith.constant dense<0.000000e+00> : vector<16x1xf32>
    %23 = tpu.matmul %22, %18, %cst_9 {dimension_numbers = #tpu.dot_dimension_numbers<[1], [0], [0], [1], [0, 0, 1, 1], [], []>} : vector<16x128xf32>, vector<128x1xf32>, vector<16x1xf32> -> vector<16x1xf32>
    %24 = vector.extract_strided_slice %23 {offsets = [0, 0], sizes = [8, 1], strides = [1, 1]} : vector<16x1xf32> to vector<8x1xf32>
    %cst_10 = arith.constant 0.0102040814 : f32
    %25 = vector.broadcast %cst_10 : f32 to vector<8x1xf32>
    %26 = arith.mulf %24, %25 : vector<8x1xf32>
    %27 = vector.extract_strided_slice %23 {offsets = [8, 0], sizes = [8, 1], strides = [1, 1]} : vector<16x1xf32> to vector<8x1xf32>
    %cst_11 = arith.constant 0.0102040814 : f32
    %28 = vector.broadcast %cst_11 : f32 to vector<8x1xf32>
    %29 = arith.mulf %27, %28 : vector<8x1xf32>
    %30 = arith.mulf %26, %26 : vector<8x1xf32>
    %31 = arith.subf %29, %30 : vector<8x1xf32>
    %cst_12 = arith.constant 9.99999974E-6 : f32
    %32 = vector.broadcast %cst_12 : f32 to vector<8x1xf32>
    %33 = arith.addf %31, %32 : vector<8x1xf32>
    %34 = math.rsqrt %33 : vector<8x1xf32>
    %35 = arith.mulf %19, %34 : vector<8x1xf32>
    %36 = arith.mulf %26, %35 : vector<8x1xf32>
    %37 = arith.subf %20, %36 : vector<8x1xf32>
    %38 = vector.broadcast %35 : vector<8x1xf32> to vector<8x128xf32>
    %39 = arith.mulf %17, %38 : vector<8x128xf32>
    %40 = vector.broadcast %37 : vector<8x1xf32> to vector<8x128xf32>
    %41 = arith.addf %39, %40 : vector<8x128xf32>
    %cst_13 = arith.constant 0.000000e+00 : f32
    %42 = vector.broadcast %cst_13 : f32 to vector<8x128xf32>
    %43 = arith.cmpf ogt, %41, %42 : vector<8x128xf32>
    %cst_14 = arith.constant -1.000000e-01 : f32
    %44 = vector.broadcast %cst_14 : f32 to vector<8x128xf32>
    %45 = arith.mulf %41, %44 : vector<8x128xf32>
    %46 = arith.select %43, %41, %45 : vector<8x128xi1>, vector<8x128xf32>
    %c0_15 = arith.constant 0 : index
    %c0_16 = arith.constant 0 : index
    %47 = vector.load %arg3[%c0_15, %c0_16] : memref<8x128xf32, #tpu.memory_space<vmem>>, vector<8x128xf32>
    tpu.vector_store %arg3[%c0_15, %c0_16], %46 {strides = array<i32>} : memref<8x128xf32, #tpu.memory_space<vmem>>, vector<8x128xf32>,
    return
  }
}

</mosaic_0001>

<bundles_post_ra>
// kernel: model_forward.1
= control target key start
LH: loop header
LB: loop body
LE: loop exit
PB: predicated region body
PF: predicated region fallthrough
CT: control target
= control target key end

     0   :  { %v371_v2 = vmov 0.0|0.0   ;;  %s372_s16 = smov 127   ;;  %vm373_vm0 = vmmov 0   ;;  %v374_v6 = vmov 0.0   ;;  %s375_s19 = smov 120   ;;  %vm29_vm1 = vcmask 588800   ;;  %s476_s0 = inlined_call_operand.vmem [shape: f32[32,128], index: 0, kind: input, shape index: {}]   ;;  %s477_s2 = inlined_call_operand.vmem [shape: f32[144,1], index: 2, kind: input, shape index: {}]   ;;  %s478_s1 = inlined_call_operand.vmem [shape: f32[8,72], index: 1, kind: input, shape index: {}]   ;;  %s479_s3 = inlined_call_operand.vmem [shape: f32[8,128], index: 3, kind: output, shape index: {}]  }
   0x1   :  { %v14_v0 = vld [vmem:[%s476_s0] sm:$0xff]  ;;  %v15_v1 = vld [vmem:[%s476_s0 + $0x8] sm:$0xff]  ;;  %311 = vmatprep.subr.bf16.mxu0 %v371_v2  ;;  %v16_v5 = vld [vmem:[%s476_s0 + $0x10] sm:$0xff]  ;;  %273 = vmatprep.mubr.msk.f32.mxu0 %vm373_vm0, %v374_v6  ;;  %s376_s5 = smov 119   ;;  %v377_v45 = vmov 0  }
   0x2   :  { %18 = vrot.lane.b32.xlu0 %v14_v0, %s372_s16  ;;  %v362_v3 = vpack.i.bf16 %v15_v1, %v14_v0  ;;  %v312_v4 = vpack.c.bf16 %v15_v1, %v14_v0  ;;  %v103_v7 = vld [vmem:[%s477_s2] sm:$0xff]  ;;  %v104_v8 = vld [vmem:[%s477_s2 + $0x8] sm:$0xff]  ;;  %v105_v9 = vld [vmem:[%s477_s2 + $0x10] sm:$0xff]  ;;  %368 = vset.pattern.permute.xlu1 %v377_v45 }
   0x3   :  { %v323_v10 = vpack.c.bf16 %v104_v8, %v103_v7  ;;  %v106_v11 = vld [vmem:[%s477_s2 + $0x18] sm:$0xff]  ;;  %v107_v13 = vld [vmem:[%s477_s2 + $0x20] sm:$0xff]  ;;  %v108_v14 = vld [vmem:[%s477_s2 + $0x28] sm:$0xff]  ;;  %367 = vset.pattern.permute.xlu0 %v377_v45 }
   0x4   :  { %363 = vrot.lane.b32.xlu1 %v362_v3, %s375_s19  ;;  %313 = vmatpush3.bf16.msra.mxu0 %v312_v4  ;;  %v327_v12 = vpack.c.bf16 %v106_v11, %v105_v9  ;;  %v331_v15 = vpack.c.bf16 %v108_v14, %v107_v13  ;;  %v109_v16 = vld [vmem:[%s477_s2 + $0x30] sm:$0xff]  ;;  %v110_v17 = vld [vmem:[%s477_s2 + $0x38] sm:$0xff]  ;;  %v111_v19 = vld [vmem:[%s477_s2 + $0x40] sm:$0xff] }
   0x5   :  { %314 = vmatprep.subr.bf16.mxu0 %v371_v2  ;;  %324 = vmatprep.subr.bf16.mxu1 %v323_v10  ;;  %v335_v18 = vpack.c.bf16 %v110_v17, %v109_v16  ;;  %v112_v20 = vld [vmem:[%s477_s2 + $0x48] sm:$0xff]  ;;  %v113_v22 = vld [vmem:[%s477_s2 + $0x50] sm:$0xff]  ;;  %v114_v23 = vld [vmem:[%s477_s2 + $0x58] sm:$0xff] }
   0x6   :  { %20 = vrot.lane.b32.xlu0 %v16_v5, %s372_s16  ;;  %326 = vmatpush3.bf16.msra.mxu1 %v323_v10  ;;  %v339_v21 = vpack.c.bf16 %v112_v20, %v111_v19  ;;  %v343_v24 = vpack.c.bf16 %v114_v23, %v113_v22  ;;  %v115_v25 = vld [vmem:[%s477_s2 + $0x60] sm:$0xff]  ;;  %v116_v26 = vld [vmem:[%s477_s2 + $0x68] sm:$0xff]  ;;  %v117_v28 = vld [vmem:[%s477_s2 + $0x70] sm:$0xff] }
   0x7   :  { %328 = vmatprep.subr.bf16.mxu1 %v327_v12  ;;  %v347_v27 = vpack.c.bf16 %v116_v26, %v115_v25  ;;  %v118_v29 = vld [vmem:[%s477_s2 + $0x78] sm:$0xff]  ;;  %v28_v41 = vld [vmem:[%s478_s1] sm:$0xff]  ;;  %v120_v56 = vld [vmem:[%s477_s2 + $0x88] sm:$0xff] }
   0x8   :  { %26 = vrot.lane.b32.xlu1 %v14_v0, %s376_s5  ;;  %v351_v30 = vpack.c.bf16 %v118_v29, %v117_v28  ;;  %v17_v33 = vld [vmem:[%s476_s0 + $0x18] sm:$0xff]  ;;  %v119_v53 = vld [vmem:[%s477_s2 + $0x80] sm:$0xff] }
   0xa   :  { %330 = vmatpush3.bf16.msra.mxu1 %v327_v12 }
   0xb   :  { %332 = vmatprep.subr.bf16.mxu1 %v331_v15 }
   0xe   :  { %334 = vmatpush3.bf16.msra.mxu1 %v331_v15 }
   0xf   :  { %336 = vmatprep.subr.bf16.mxu1 %v335_v18 }
  0x12   :  { %338 = vmatpush3.bf16.msra.mxu1 %v335_v18 }
  0x13   :  { %340 = vmatprep.subr.bf16.mxu1 %v339_v21 }
  0x16   :  { %342 = vmatpush3.bf16.msra.mxu1 %v339_v21 }
  0x17   :  { %344 = vmatprep.subr.bf16.mxu1 %v343_v24 }
  0x1a   :  { %346 = vmatpush3.bf16.msra.mxu1 %v343_v24 }
  0x1b   :  { %348 = vmatprep.subr.bf16.mxu1 %v347_v27 }
  0x1e   :  { %350 = vmatpush3.bf16.msra.mxu1 %v347_v27 }
  0x1f   :  { %352 = vmatprep.subr.bf16.mxu1 %v351_v30 }
  0x22   :  { %354 = vmatpush3.bf16.msra.mxu1 %v351_v30 }
  0x74   :  { %v19_v31 = vpop.permute.xlu0 %18 }
  0x75   :  { %v315_v32 = vpack.c.bf16 %v16_v5, %v19_v31 }
  0x76   :  { %v364_v34 = vpop.permute.xlu1 %363 }
  0x77   :  { %316 = vmatpush3.bf16.msra.mxu0 %v315_v32  ;;  %v366_v35 = vunpack.i.h.bf16 %v364_v34  ;;  %v365_v36 = vunpack.i.l.bf16 %v364_v34 }
  0x78   :  { %v21_v37 = vpop.permute.xlu0 %20  ;;  %317 = vmatprep.subr.bf16.mxu0 %v371_v2 }
  0x79   :  { %v318_v38 = vpack.c.bf16 %v21_v37, %v17_v33  ;;  %v321_v39 = vpack.c.bf16 %v366_v35, %v365_v36 }
  0x7a   :  { %v27_v40 = vpop.permute.xlu1 %26 }
  0x7b   :  { %319 = vmatpush3.bf16.msra.mxu0 %v318_v38 }
  0x7c   :  { %320 = vmatprep.subr.bf16.mxu0 %v371_v2 }
  0x7f   :  { %322 = vmatpush3.bf16.msra.mxu0 %v321_v39 }
  0x80   :  { %271 = vmatprep.subr.mxu0 %v374_v6 }
  0x83   :  { %272 = vmatpush3.msra.mxu0 %v27_v40 }
  0x84   :  { %274 = vmatmul.mubr.msk.f32.vlgmr.msra.gmra.mrb[0].mxu0 %vm29_vm1, %v28_v41 }
 0x157   :  { %v99_v42 = vpop.f32.mrb[0].mxu0 }
 0x158   :  { %v121_v43 = vmul.f32 %v99_v42, %v99_v42  ;;  %v275_v44 = vpop.f32.mrb[1].mxu0  ;;  %308 = vmatprep.mubr.f32.mxu1 %v99_v42 }
 0x15a   :  { %309 = vmatmul.mubr.f32.vlgmr.msra.gmra.mrb[0].mxu1 %v121_v43 }
 0x22d   :  { %v310_v46 = vpop.f32.mrb[0].mxu1 }
 0x22e   :  { %v188_v47 = vpop.f32.mrb[1].mxu1  ;;  %v198_v49 = vmul.f32 0.010204081, %v310_v46 }
 0x22f   :  { %v197_v48 = vmul.f32 0.010204081, %v188_v47 }
 0x231   :  { %v199_v50 = vmul.f32 %v197_v48, %v197_v48 }
 0x233   :  { %v200_v51 = vsub.f32 %v198_v49, %v199_v50 }
 0x235   :  { %v201_v52 = vadd.f32 1e-05, %v200_v51 }
 0x237   :  { %369 = vrsqrt.f32 %v201_v52 }
 0x241   :  { %v370_v54 = vpop.eup %369 }
 0x242   :  { %v203_v55 = vmul.f32 %v370_v54, %v119_v53 }
 0x244   :  { %v204_v57 = vmul.f32 %v203_v55, %v197_v48  ;;  %208 = vperm.xlu0 %367, %v203_v55  }
 0x246   :  { %v205_v58 = vsub.f32 %v120_v56, %v204_v57 }
 0x248   :  { %214 = vperm.xlu1 %368, %v205_v58  }
 0x2c3   :  { %v209_v59 = vpop.permute.xlu0 %208 }
 0x2c4   :  { %v211_v60 = vmul.f32 %v209_v59, %v99_v42 }
 0x2c7   :  { %v215_v61 = vpop.permute.xlu1 %214 }
 0x2c8   :  { %v217_v62 = vadd.f32 %v215_v61, %v211_v60 }
 0x2ca   :  { %vm218_vm2 = vcmp.gt.f32.partialorder %v217_v62, 0.0  ;;  %v219_v63 = vmul.f32 -0.1, %v217_v62 }
 0x2cc   :  { %v220_v0 = vsel %vm218_vm2, %v217_v62, %v219_v63 }
 0x2cd   :  { %221 = vst [vmem:[%s479_s3] sm:$0xff] %v220_v0 }

</bundles_post_ra>
